<compile_context>
chip_gen: v6e
topology: v6e:2x2x1
jax: 0.10.0
libtpu: 0.0.40
codegen_flags: <defaults>
</compile_context>

<pallas_src>
import functools

import jax
import jax.numpy as jnp
from jax import lax
from jax.experimental import pallas as pl
from jax.experimental.pallas import tpu as pltpu


def _flash_attn_kernel(scale_ref, seed_ref, q_ref, k_ref, v_ref, o_ref,
                       qs_sc, m_sc, l_sc, acc_sc, *,
                       dropout_p, seq_len, tk, mask_kv, mm_dtype):
    """One (q-tile, kv-tile) step of flash attention with online softmax.

    Block shapes (batch dim squeezed away by the BlockSpecs):
      q_ref, o_ref: (TQ, D)   k_ref, v_ref: (TK, D)
      qs_sc: (TQ, D) pre-scaled q   m_sc, l_sc: (TQ, 1) f32   acc_sc: (TQ, D) f32
    Scratch persists across the kv (innermost, "arbitrary") grid axis.
    """
    kv = pl.program_id(2)
    nk = pl.num_programs(2)
    tq = q_ref.shape[0]

    @pl.when(kv == 0)
    def _init():
        # Fold the softmax scale into q once per q-tile (TQxD, not per kv step).
        qs_sc[...] = (q_ref[...] * scale_ref[0].astype(q_ref.dtype)).astype(qs_sc.dtype)
        m_sc[...] = jnp.full(m_sc.shape, -jnp.inf, jnp.float32)
        l_sc[...] = jnp.zeros(l_sc.shape, jnp.float32)
        acc_sc[...] = jnp.zeros(acc_sc.shape, jnp.float32)

    k = k_ref[...]
    v = v_ref[...]
    if mm_dtype is not None:
        k = k.astype(mm_dtype)
        v = v.astype(mm_dtype)

    # Scores (TQ, TK): native-dtype MXU operands, f32 accumulation.
    s = lax.dot_general(qs_sc[...], k, (((1,), (1,)), ((), ())),
                        preferred_element_type=jnp.float32)

    if mask_kv:
        # Ragged kv tail: padded score columns -> -inf; padded V rows -> 0 so
        # zero-probability columns cannot pull in non-finite garbage.
        col = kv * tk + lax.broadcasted_iota(jnp.int32, s.shape, 1)
        s = jnp.where(col < seq_len, s, -jnp.inf)
        vrow = kv * tk + lax.broadcasted_iota(jnp.int32, v.shape, 0)
        v = jnp.where(vrow < seq_len, v, jnp.zeros_like(v))

    # ---- online softmax update ----
    m_prev = m_sc[...]
    m_new = jnp.maximum(m_prev, jnp.max(s, axis=-1, keepdims=True))
    alpha = jnp.exp(m_prev - m_new)
    p = jnp.exp(s - m_new)                               # un-normalized probs
    l_sc[...] = alpha * l_sc[...] + jnp.sum(p, axis=-1, keepdims=True)

    # ---- dropout (inverted, like F.dropout(training=True)) ----
    # Applied to the numerator only; the denominator l uses the un-dropped
    # probabilities, which matches dropout(softmax(s)) @ V exactly.  The
    # 1/(1-p) rescale is folded into the finalize step (once per q-tile).
    if dropout_p >= 1.0:
        p_v = jnp.zeros_like(p)                          # PyTorch returns zeros at p=1
    elif dropout_p > 0.0:
        # Counter-based hash RNG on global (b, row, col) + seed.  Pure jnp ops
        # -> works under interpret mode and on TPU (no pltpu.prng_* needed).
        # TODO(synk): does not bit-match torch's dropout RNG (statistically
        # equivalent inverted dropout only).
        qi = pl.program_id(1)
        b = pl.program_id(0)
        gr = (qi * tq + lax.broadcasted_iota(jnp.int32, p.shape, 0)).astype(jnp.uint32)
        gc = (kv * tk + lax.broadcasted_iota(jnp.int32, p.shape, 1)).astype(jnp.uint32)
        mix = ((b.astype(jnp.uint32) * jnp.uint32(0x632BE59B))
               ^ (seed_ref[0].astype(jnp.uint32) * jnp.uint32(0x9E3779B9)))
        x = (gr * jnp.uint32(0x9E3779B1)) ^ (gc * jnp.uint32(0x85EBCA77)) ^ mix
        # lowbias32 finalizer
        x = x ^ (x >> 16)
        x = x * jnp.uint32(0x7FEB352D)
        x = x ^ (x >> 15)
        x = x * jnp.uint32(0x846CA68B)
        x = x ^ (x >> 16)
        u = (x >> 8).astype(jnp.int32).astype(jnp.float32) * jnp.float32(1.0 / (1 << 24))
        p_v = jnp.where(u >= jnp.float32(dropout_p), p, jnp.float32(0.0))
    else:
        p_v = p

    acc_sc[...] = alpha * acc_sc[...] + jnp.dot(
        p_v.astype(v.dtype), v, preferred_element_type=jnp.float32)
    m_sc[...] = m_new

    @pl.when(kv == nk - 1)
    def _finalize():
        out_scale = 1.0 / (1.0 - dropout_p) if 0.0 < dropout_p < 1.0 else 1.0
        # Exact normalization (cheap: a (tq,1) divide, once per q-tile).
        o_ref[...] = (acc_sc[...] * (jnp.float32(out_scale) / l_sc[...])).astype(o_ref.dtype)


def _round_up(x, m):
    return ((x + m - 1) // m) * m


def _default_tiles(s):
    # Large q tile amortizes K/V HBM re-streaming (traffic scales with nq);
    # moderate kv tile keeps the per-step (tq, tk) temporaries small.
    tq = s if s <= 512 else 512
    tk = s if s <= 256 else 256
    return tq, tk


def sdp_attention(query, key, value, scale_factor, dropout_p=0.0, seed=0,
                  tq=None, tk=None, matmul_dtype=None):
    """Pallas implementation of Model.forward(query, key, value, scale_factor, dropout_p)."""
    B, S, D = query.shape
    dtq, dtk = _default_tiles(S)
    tq = dtq if tq is None else tq
    tk = dtk if tk is None else tk
    # Block legality: a seq-tile must be a multiple of 8 or equal the full dim.
    tq = S if tq >= S else _round_up(tq, 8)
    tk = S if tk >= S else _round_up(tk, 8)
    nq = pl.cdiv(S, tq)
    nk = pl.cdiv(S, tk)
    mask_kv = (S % tk) != 0

    scale = jnp.asarray(scale_factor, jnp.float32).reshape((1,))
    seed_arr = jnp.asarray(seed, jnp.int32).reshape((1,))
    qs_dtype = matmul_dtype if matmul_dtype is not None else query.dtype

    kernel = functools.partial(
        _flash_attn_kernel, dropout_p=float(dropout_p), seq_len=S, tk=tk,
        mask_kv=mask_kv, mm_dtype=matmul_dtype)

    smem_spec = pl.BlockSpec(memory_space=pltpu.MemorySpace.SMEM)
    q_spec = pl.BlockSpec((pl.Squeezed(), tq, D), lambda b, qi, kv: (b, qi, 0))
    kv_spec = pl.BlockSpec((pl.Squeezed(), tk, D), lambda b, qi, kv: (b, kv, 0))
    o_spec = pl.BlockSpec((pl.Squeezed(), tq, D), lambda b, qi, kv: (b, qi, 0))

    itemsize = jnp.dtype(query.dtype).itemsize
    cost = pl.CostEstimate(
        flops=4 * B * S * S * D,                       # two matmuls
        transcendentals=B * S * S,                     # exp
        bytes_accessed=itemsize * (2 * B * S * D       # Q read + O write
                                   + 2 * nq * B * S * D))  # K+V streamed per q-tile

    return pl.pallas_call(
        kernel,
        out_shape=jax.ShapeDtypeStruct((B, S, D), query.dtype),
        grid=(B, nq, nk),
        in_specs=[smem_spec, smem_spec, q_spec, kv_spec, kv_spec],
        out_specs=o_spec,
        scratch_shapes=[
            pltpu.VMEM((tq, D), qs_dtype),      # pre-scaled q (written at kv==0)
            pltpu.VMEM((tq, 1), jnp.float32),   # running max m
            pltpu.VMEM((tq, 1), jnp.float32),   # running sum l
            pltpu.VMEM((tq, D), jnp.float32),   # output accumulator
        ],
        compiler_params=pltpu.CompilerParams(
            dimension_semantics=("parallel", "parallel", "arbitrary"),
            vmem_limit_bytes=32 * 1024 * 1024),
        cost_estimate=cost,
    )(scale, seed_arr, query, key, value)


def _reference(query, key, value, scale_factor):
    # Pure-JAX reference (dropout_p = 0 path).
    s = jnp.einsum("bqd,bkd->bqk", query, key) * scale_factor
    p = jax.nn.softmax(s, axis=-1)
    return jnp.einsum("bqk,bkd->bqd", p, value)


if __name__ == "__main__":
    # Shapes implied by the PyTorch module spec.
    batch_size = 1
    seq_len = 3
    dim_size = 128 + 128

    k0 = jax.random.PRNGKey(0)
    kq, kk, kv_, ks = jax.random.split(k0, 4)
    query = jax.random.normal(kq, (batch_size, seq_len, dim_size), jnp.float32)
    key = jax.random.normal(kk, (batch_size, seq_len, dim_size), jnp.float32)
    value = jax.random.normal(kv_, (batch_size, seq_len, dim_size), jnp.float32)
    scale_factor = jax.nn.sigmoid(jax.random.normal(ks, (1,), jnp.float32))[0]

    out = jax.block_until_ready(
        sdp_attention(query, key, value, scale_factor, dropout_p=0.0))
    ref = _reference(query, key, value, scale_factor)
    assert out.shape == (batch_size, seq_len, dim_size)
    assert jnp.allclose(out, ref, atol=5e-3, rtol=5e-3), "mismatch vs reference (S=3)"

    # Multi-tile path: exercises the online softmax across several kv tiles.
    B2, S2, D2 = 1, 256, 128
    q2, k2, v2 = (jax.random.normal(k, (B2, S2, D2), jnp.float32)
                  for k in jax.random.split(jax.random.PRNGKey(1), 3))
    out2 = jax.block_until_ready(
        sdp_attention(q2, k2, v2, scale_factor, dropout_p=0.0, tq=128, tk=128))
    ref2 = _reference(q2, k2, v2, scale_factor)
    assert jnp.allclose(out2, ref2, atol=5e-3, rtol=5e-3), "mismatch vs reference (tiled)"

    # Ragged seq_len: exercises the masked kv tail and partial q/output blocks.
    B3, S3, D3 = 1, 200, 128
    q3, k3, v3 = (jax.random.normal(k, (B3, S3, D3), jnp.float32)
                  for k in jax.random.split(jax.random.PRNGKey(2), 3))
    out3 = jax.block_until_ready(
        sdp_attention(q3, k3, v3, scale_factor, dropout_p=0.0, tq=128, tk=128))
    ref3 = _reference(q3, k3, v3, scale_factor)
    assert jnp.allclose(out3, ref3, atol=5e-3, rtol=5e-3), "mismatch vs reference (ragged)"

    # Dropout path (p > 0): stochastic, so just check it runs and stays finite.
    out4 = jax.block_until_ready(
        sdp_attention(q2, k2, v2, scale_factor, dropout_p=0.5, seed=123,
                      tq=128, tk=128))
    assert out4.shape == (B2, S2, D2)
    assert bool(jnp.all(jnp.isfinite(out4)))

    print("KERNEL_OK")
</pallas_src>

<mosaic_0001>
module attributes {stable_mosaic.version = 11 : i64} {
  func.func @_flash_attn_kernel(%arg0: i32, %arg1: i32, %arg2: i32, %arg3: memref<1xf32, #tpu.memory_space<smem>>, %arg4: memref<1xi32, #tpu.memory_space<smem>>, %arg5: memref<1x3x256xf32, #tpu.memory_space<vmem>>, %arg6: memref<1x3x256xf32, #tpu.memory_space<vmem>>, %arg7: memref<1x3x256xf32, #tpu.memory_space<vmem>>, %arg8: memref<1x3x256xf32, #tpu.memory_space<vmem>>, %arg9: memref<3x256xf32, #tpu.memory_space<vmem>>, %arg10: memref<3x1xf32, #tpu.memory_space<vmem>>, %arg11: memref<3x1xf32, #tpu.memory_space<vmem>>, %arg12: memref<3x256xf32, #tpu.memory_space<vmem>>) attributes {dimension_semantics = [#tpu.dimension_semantics<parallel>, #tpu.dimension_semantics<parallel>, #tpu.dimension_semantics<arbitrary>], iteration_bounds = array<i64: 1, 1, 1>, scalar_prefetch = 0 : i64, scratch_operands = 4 : i64, tpu.core_type = #tpu.core_type<tc>, window_params = [{transform_indices = @transform_0, window_bounds = array<i64: 1>}, {transform_indices = @transform_1, window_bounds = array<i64: 1>}, {transform_indices = @transform_2, window_bounds = array<i64: 1, 3, 256>}, {transform_indices = @transform_3, window_bounds = array<i64: 1, 3, 256>}, {transform_indices = @transform_4, window_bounds = array<i64: 1, 3, 256>}, {transform_indices = @transform_5, window_bounds = array<i64: 1, 3, 256>}]} {
    %c0_i32 = arith.constant 0 : i32
    %0 = arith.cmpi eq, %arg2, %c0_i32 : i32
    %1 = arith.extui %0 : i1 to i32
    %c0_i32_0 = arith.constant 0 : i32
    %2 = arith.cmpi ne, %1, %c0_i32_0 : i32
    scf.if %2 {
      %c0_25 = arith.constant 0 : index
      %c0_26 = arith.constant 0 : index
      %c0_27 = arith.constant 0 : index
      %34 = vector.load %arg5[%c0_25, %c0_26, %c0_27] : memref<1x3x256xf32, #tpu.memory_space<vmem>>, vector<1x3x256xf32>
      %35 = vector.shape_cast %34 : vector<1x3x256xf32> to vector<3x256xf32>
      %c0_28 = arith.constant 0 : index
      %36 = memref.load %arg3[%c0_28] : memref<1xf32, #tpu.memory_space<smem>>
      %37 = vector.broadcast %36 : f32 to vector<3x256xf32>
      %38 = arith.mulf %35, %37 : vector<3x256xf32>
      %c0_29 = arith.constant 0 : index
      %c0_30 = arith.constant 0 : index
      %39 = vector.load %arg9[%c0_29, %c0_30] : memref<3x256xf32, #tpu.memory_space<vmem>>, vector<3x256xf32>
      tpu.vector_store %arg9[%c0_29, %c0_30], %38 {strides = array<i32>} : memref<3x256xf32, #tpu.memory_space<vmem>>, vector<3x256xf32>,
      %cst_31 = arith.constant 0xFF800000 : f32
      %40 = vector.broadcast %cst_31 : f32 to vector<3x1xf32>
      %c0_32 = arith.constant 0 : index
      %c0_33 = arith.constant 0 : index
      %41 = vector.load %arg10[%c0_32, %c0_33] : memref<3x1xf32, #tpu.memory_space<vmem>>, vector<3x1xf32>
      tpu.vector_store %arg10[%c0_32, %c0_33], %40 {strides = array<i32>} : memref<3x1xf32, #tpu.memory_space<vmem>>, vector<3x1xf32>,
      %cst_34 = arith.constant 0.000000e+00 : f32
      %42 = vector.broadcast %cst_34 : f32 to vector<3x1xf32>
      %c0_35 = arith.constant 0 : index
      %c0_36 = arith.constant 0 : index
      %43 = vector.load %arg11[%c0_35, %c0_36] : memref<3x1xf32, #tpu.memory_space<vmem>>, vector<3x1xf32>
      tpu.vector_store %arg11[%c0_35, %c0_36], %42 {strides = array<i32>} : memref<3x1xf32, #tpu.memory_space<vmem>>, vector<3x1xf32>,
      %cst_37 = arith.constant 0.000000e+00 : f32
      %44 = vector.broadcast %cst_37 : f32 to vector<3x256xf32>
      %c0_38 = arith.constant 0 : index
      %c0_39 = arith.constant 0 : index
      %45 = vector.load %arg12[%c0_38, %c0_39] : memref<3x256xf32, #tpu.memory_space<vmem>>, vector<3x256xf32>
      tpu.vector_store %arg12[%c0_38, %c0_39], %44 {strides = array<i32>} : memref<3x256xf32, #tpu.memory_space<vmem>>, vector<3x256xf32>,
    } else {
    }
    %c0 = arith.constant 0 : index
    %c0_1 = arith.constant 0 : index
    %c0_2 = arith.constant 0 : index
    %3 = vector.load %arg6[%c0, %c0_1, %c0_2] : memref<1x3x256xf32, #tpu.memory_space<vmem>>, vector<1x3x256xf32>
    %4 = vector.shape_cast %3 : vector<1x3x256xf32> to vector<3x256xf32>
    %c0_3 = arith.constant 0 : index
    %c0_4 = arith.constant 0 : index
    %c0_5 = arith.constant 0 : index
    %5 = vector.load %arg7[%c0_3, %c0_4, %c0_5] : memref<1x3x256xf32, #tpu.memory_space<vmem>>, vector<1x3x256xf32>
    %6 = vector.shape_cast %5 : vector<1x3x256xf32> to vector<3x256xf32>
    %c0_6 = arith.constant 0 : index
    %c0_7 = arith.constant 0 : index
    %7 = vector.load %arg9[%c0_6, %c0_7] : memref<3x256xf32, #tpu.memory_space<vmem>>, vector<3x256xf32>
    %cst = arith.constant dense<0.000000e+00> : vector<3x3xf32>
    %8 = tpu.matmul %7, %4, %cst {dimension_numbers = #tpu.dot_dimension_numbers<[1], [1], [0], [0], [0, 0, 1, 0], [], []>} : vector<3x256xf32>, vector<3x256xf32>, vector<3x3xf32> -> vector<3x3xf32>
    %c0_8 = arith.constant 0 : index
    %c0_9 = arith.constant 0 : index
    %9 = vector.load %arg10[%c0_8, %c0_9] : memref<3x1xf32, #tpu.memory_space<vmem>>, vector<3x1xf32>
    %cst_10 = arith.constant dense<0xFF800000> : vector<3xf32>
    %10 = vector.multi_reduction <maximumf>, %8, %cst_10 [1] : vector<3x3xf32> to vector<3xf32>
    %11 = vector.shape_cast %10 : vector<3xf32> to vector<3x1xf32>
    %12 = arith.maximumf %9, %11 : vector<3x1xf32>
    %13 = arith.subf %9, %12 : vector<3x1xf32>
    %14 = math.exp %13 : vector<3x1xf32>
    %15 = vector.broadcast %12 : vector<3x1xf32> to vector<3x3xf32>
    %16 = arith.subf %8, %15 : vector<3x3xf32>
    %17 = math.exp %16 : vector<3x3xf32>
    %c0_11 = arith.constant 0 : index
    %c0_12 = arith.constant 0 : index
    %18 = vector.load %arg11[%c0_11, %c0_12] : memref<3x1xf32, #tpu.memory_space<vmem>>, vector<3x1xf32>
    %19 = arith.mulf %14, %18 : vector<3x1xf32>
    %cst_13 = arith.constant dense<0.000000e+00> : vector<3xf32>
    %20 = vector.multi_reduction <add>, %17, %cst_13 [1] : vector<3x3xf32> to vector<3xf32>
    %21 = vector.shape_cast %20 : vector<3xf32> to vector<3x1xf32>
    %22 = arith.addf %19, %21 : vector<3x1xf32>
    %c0_14 = arith.constant 0 : index
    %c0_15 = arith.constant 0 : index
    %23 = vector.load %arg11[%c0_14, %c0_15] : memref<3x1xf32, #tpu.memory_space<vmem>>, vector<3x1xf32>
    tpu.vector_store %arg11[%c0_14, %c0_15], %22 {strides = array<i32>} : memref<3x1xf32, #tpu.memory_space<vmem>>, vector<3x1xf32>,
    %c0_16 = arith.constant 0 : index
    %c0_17 = arith.constant 0 : index
    %24 = vector.load %arg12[%c0_16, %c0_17] : memref<3x256xf32, #tpu.memory_space<vmem>>, vector<3x256xf32>
    %25 = vector.broadcast %14 : vector<3x1xf32> to vector<3x256xf32>
    %26 = arith.mulf %25, %24 : vector<3x256xf32>
    %cst_18 = arith.constant dense<0.000000e+00> : vector<3x256xf32>
    %27 = tpu.matmul %17, %6, %cst_18 {dimension_numbers = #tpu.dot_dimension_numbers<[1], [0], [0], [1], [0, 0, 1, 1], [], []>} : vector<3x3xf32>, vector<3x256xf32>, vector<3x256xf32> -> vector<3x256xf32>
    %28 = arith.addf %26, %27 : vector<3x256xf32>
    %c0_19 = arith.constant 0 : index
    %c0_20 = arith.constant 0 : index
    %29 = vector.load %arg12[%c0_19, %c0_20] : memref<3x256xf32, #tpu.memory_space<vmem>>, vector<3x256xf32>
    tpu.vector_store %arg12[%c0_19, %c0_20], %28 {strides = array<i32>} : memref<3x256xf32, #tpu.memory_space<vmem>>, vector<3x256xf32>,
    %c0_21 = arith.constant 0 : index
    %c0_22 = arith.constant 0 : index
    %30 = vector.load %arg10[%c0_21, %c0_22] : memref<3x1xf32, #tpu.memory_space<vmem>>, vector<3x1xf32>
    tpu.vector_store %arg10[%c0_21, %c0_22], %12 {strides = array<i32>} : memref<3x1xf32, #tpu.memory_space<vmem>>, vector<3x1xf32>,
    %c0_i32_23 = arith.constant 0 : i32
    %31 = arith.cmpi eq, %arg2, %c0_i32_23 : i32
    %32 = arith.extui %31 : i1 to i32
    %c0_i32_24 = arith.constant 0 : i32
    %33 = arith.cmpi ne, %32, %c0_i32_24 : i32
    scf.if %33 {
      %c0_25 = arith.constant 0 : index
      %c0_26 = arith.constant 0 : index
      %34 = vector.load %arg12[%c0_25, %c0_26] : memref<3x256xf32, #tpu.memory_space<vmem>>, vector<3x256xf32>
      %c0_27 = arith.constant 0 : index
      %c0_28 = arith.constant 0 : index
      %35 = vector.load %arg11[%c0_27, %c0_28] : memref<3x1xf32, #tpu.memory_space<vmem>>, vector<3x1xf32>
      %cst_29 = arith.constant 1.000000e+00 : f32
      %36 = vector.broadcast %cst_29 : f32 to vector<3x1xf32>
      %37 = arith.divf %36, %35 : vector<3x1xf32>
      %38 = vector.broadcast %37 : vector<3x1xf32> to vector<3x256xf32>
      %39 = arith.mulf %34, %38 : vector<3x256xf32>
      %c0_30 = arith.constant 0 : index
      %c0_31 = arith.constant 0 : index
      %c0_32 = arith.constant 0 : index
      %40 = vector.load %arg8[%c0_30, %c0_31, %c0_32] : memref<1x3x256xf32, #tpu.memory_space<vmem>>, vector<1x3x256xf32>
      %41 = vector.shape_cast %40 : vector<1x3x256xf32> to vector<3x256xf32>
      %42 = vector.shape_cast %39 : vector<3x256xf32> to vector<1x3x256xf32>
      tpu.vector_store %arg8[%c0_30, %c0_31, %c0_32], %42 {strides = array<i32>} : memref<1x3x256xf32, #tpu.memory_space<vmem>>, vector<1x3x256xf32>,
    } else {
    }
    return
  }
  func.func @transform_0(%arg0: i32, %arg1: i32, %arg2: i32) -> i32 {
    %c0_i32 = arith.constant 0 : i32
    %c0_i32_0 = arith.constant 0 : i32
    return %c0_i32 : i32
  }
  func.func @transform_1(%arg0: i32, %arg1: i32, %arg2: i32) -> i32 {
    %c0_i32 = arith.constant 0 : i32
    %c0_i32_0 = arith.constant 0 : i32
    return %c0_i32 : i32
  }
  func.func @transform_2(%arg0: i32, %arg1: i32, %arg2: i32) -> (i32, i32, i32) {
    %c0_i32 = arith.constant 0 : i32
    %c0_i32_0 = arith.constant 0 : i32
    return %arg0, %arg1, %c0_i32 : i32, i32, i32
  }
  func.func @transform_3(%arg0: i32, %arg1: i32, %arg2: i32) -> (i32, i32, i32) {
    %c0_i32 = arith.constant 0 : i32
    %c0_i32_0 = arith.constant 0 : i32
    return %arg0, %arg2, %c0_i32 : i32, i32, i32
  }
  func.func @transform_4(%arg0: i32, %arg1: i32, %arg2: i32) -> (i32, i32, i32) {
    %c0_i32 = arith.constant 0 : i32
    %c0_i32_0 = arith.constant 0 : i32
    return %arg0, %arg2, %c0_i32 : i32, i32, i32
  }
  func.func @transform_5(%arg0: i32, %arg1: i32, %arg2: i32) -> (i32, i32, i32) {
    %c0_i32 = arith.constant 0 : i32
    %c0_i32_0 = arith.constant 0 : i32
    return %arg0, %arg1, %c0_i32 : i32, i32, i32
  }
}

</mosaic_0001>

<bundles_post_ra>
// kernel: tpu_custom_call.1
= control target key start
LH: loop header
LB: loop body
LE: loop exit
PB: predicated region body
PF: predicated region fallthrough
CT: control target
= control target key end

     0   :  { %vm31_vm0 = vcmask 2048   ;;  %v284_v7 = vmov -inf   ;;  %vm115_vm1 = vcmask 18432   ;;  %v285_v11 = vmov 0   ;;  %s339_s1 = inlined_call_operand.<no memory space> [shape: s32[1], index: 1, kind: input, shape index: {}]   ;;  %s340_s3 = inlined_call_operand.vmem [shape: f32[1,3,256], index: 3, kind: input, shape index: {}]   ;;  %s341_s0 = inlined_call_operand.<no memory space> [shape: f32[1], index: 0, kind: input, shape index: {}]   ;;  %s342_s2 = inlined_call_operand.vmem [shape: f32[1,3,256], index: 2, kind: input, shape index: {}]   ;;  %s343_s4 = inlined_call_operand.vmem [shape: f32[1,3,256], index: 4, kind: input, shape index: {}]   ;;  %s344_s5 = inlined_call_operand.vmem [shape: f32[1,3,256], index: 5, kind: output, shape index: {}]  }
   0x1   :  { %v35_v0 = vld [vmem:[%s340_s3] sm:$0x77]  ;;  %v28_v2 = vstv %s341_s0  ;;  %32 = vst.msk [vmem:[#allocation3] sm:$0x7] %vm31_vm0, %v284_v7  ;;  %272 = vset.pattern.permute.xlu0 %v285_v11  ;;  %273 = vset.pattern.permute.xlu1 %v285_v11  ;;  %v286_v12 = vmov 0.0   ;;  %vm156_vm2 = vcmask 1042432   ;;  %v254_v44 = vlaneseq }
   0x2   :  { %v26_v1 = vld [vmem:[%s342_s2] sm:$0x77]  ;;  %v42_v3 = vcombine.high %v35_v0, %v35_v0  ;;  %33 = vst.msk [vmem:[#allocation4] sm:$0x7] %vm31_vm0, %v286_v12  ;;  %34 = vst [vmem:[#allocation5] sm:$0x77] %v286_v12  ;;  %225 = vmatprep.mubr.f32.mxu1 %v286_v12 }
   0x3   :  { %v29_v4 = vmul.f32 %v28_v2, %v26_v1  ;;  %v36_v17 = vld [vmem:[%s343_s4] sm:$0x77]  ;;  %vm152_vm3 = vcmask 23552   ;;  %v287_v42 = vmov 839922192   ;;  %v255_v46 = vshrl.u32 %v254_v44, 7 }
   0x4   :  { %74 = vmatprep.subr.mxu0 %v42_v3  ;;  %v151_v18 = vcombine.high %v36_v17, %v36_v17  ;;  %v252_v43 = vunpack.c.l.s4 %v287_v42 }
   0x5   :  { %30 = vst [vmem:[#allocation2] sm:$0x77] %v29_v4  ;;  %75 = vmatpush1.xpose.msra.mxu0 %v35_v0 }
   0x6   :  { %265 = vmatprep.subr.msk.mxu1 %vm156_vm2, %v151_v18  ;;  %v253_v45 = vunpack.c.0.s8 %v252_v43 }
   0x7   :  { %266 = vmatpush1.msk.msra.mxu1 %vm156_vm2, %v36_v17 }
   0x8   :  { %v114_v13 = vld [vmem:[#allocation3] sm:$0x7]  ;;  %v256_v47 = vsub.s32 %v253_v45, %v255_v46 }
   0x9   :  { %v131_v26 = vld [vmem:[#allocation4] sm:$0x7]  ;;  %v139_v32 = vld [vmem:[#allocation5] sm:$0x77] }
   0xa   :  { %v146_v33 = vcombine.high %v139_v32, %v139_v32 }
   0xc   :  { %v37_v5 = vld [vmem:[#allocation2] sm:$0x77] }
   0xd   :  { %v39_v6 = vcombine.high %v37_v5, %v37_v5 }
   0xf   :  { %108 = vmatprep.mubr.f32.mxu0 %v39_v6 }
  0x10   :  { %109 = vmatmul.mubr.f32.vlgmr.msra.gmra.mxu0 %v37_v5 }
  0xd0   :  { %v110_v8 = vpop.f32.mrf.mxu0 }
  0xd1   :  { %v116_v9 = vsel %vm115_vm1, %v110_v8, -inf }
  0xd2   :  { %117 = vmax.xlane.f32.xlu0 %v116_v9  ;;  %v112_v10 = vpop.f32.mrf.mxu0 }
 0x15b   :  { %v118_v14 = vpop.xlane.xlu0 %117 }
 0x15c   :  { %v119_v15 = vmax.f32 %v114_v13, %v118_v14 }
 0x15e   :  { %v120_v16 = vsub.f32 %v114_v13, %v119_v15  ;;  %239 = vst.msk [vmem:[#allocation3] sm:$0x7] %vm31_vm0, %v119_v15  ;;  %125 = vperm.xlu0 %272, %v119_v15  }
 0x160   :  { %v121_v23 = vmul.f32 1.442695, %v120_v16 }
 0x1d9   :  { %v126_v19 = vpop.permute.xlu0 %125 }
 0x1da   :  { %v128_v20 = vsub.f32 %v110_v8, %v126_v19 }
 0x1dc   :  { %v129_v21 = vmul.f32 1.442695, %v128_v20 }
 0x1de   :  { %278 = vpow2.f32 %v129_v21 }
 0x1df   :  { %280 = vpow2.f32 %v121_v23 }
 0x1eb   :  { %v279_v22 = vpop.eup %278 }
 0x1ec   :  { %267 = vmatmul.mubr.msk.f32.vlgmr.msra.gmra.mxu1 %vm152_vm3, %v279_v22  ;;  %v133_v24 = vsel %vm115_vm1, %v279_v22, 0.0  ;;  %v281_v25 = vpop.eup %280 }
 0x1ed   :  { %134 = vadd.xlane.f32.xlu1 %v133_v24  ;;  %v132_v27 = vmul.f32 %v281_v25, %v131_v26 }
 0x1fe   :  { %142 = vperm.xlu1 %273, %v281_v25  }
 0x276   :  { %v135_v28 = vpop.xlane.xlu1 %134 }
 0x277   :  { %v136_v29 = vadd.f32 %v135_v28, %v132_v27 }
 0x279   :  { %138 = vst.msk [vmem:[#allocation4] sm:$0x7] %vm31_vm0, %v136_v29 }
 0x27a   :  { %v143_v34 = vpop.permute.xlu1 %142 }
 0x27b   :  { %v148_v36 = vmul.f32 %v143_v34, %v139_v32  ;;  %v149_v37 = vmul.f32 %v146_v33, %v143_v34 }
 0x280   :  { %v244_v30 = vld [vmem:[#allocation4] sm:$0x7] }
 0x281   :  { %282 = vrcp.f32 %v244_v30 }
 0x28e   :  { %v283_v31 = vpop.eup %282 }
 0x28f   :  { %249 = vperm.xlu1 %273, %v283_v31  }
 0x2ac   :  { %v227_v35 = vpop.f32.mrf.mxu1 }
 0x2ad   :  { %v232_v39 = vadd.f32 %v227_v35, %v148_v36 }
 0x2ae   :  { %v229_v38 = vpop.f32.mrf.mxu1 }
 0x2af   :  { %v233_v40 = vadd.f32 %v229_v38, %v149_v37 }
 0x2b1   :  { %v236_v41 = vcombine.low %v232_v39, %v233_v40 }
 0x2b3   :  { %238 = vst [vmem:[#allocation5] sm:$0x77] %v236_v41 }
 0x2ba   :  { %v243_v50 = vld [vmem:[#allocation5] sm:$0x77] }
 0x30a   :  { %v250_v48 = vpop.permute.xlu1 %249 }
 0x30b   :  { %v257_v49 = vrot.slane %v250_v48, %v256_v47 }
 0x30d   :  { %v259_v51 = vmul.f32 %v257_v49, %v243_v50 }
 0x30f   :  { %260 = vst [vmem:[%s344_s5] sm:$0x77] %v259_v51 }

</bundles_post_ra>
